<compile_context>
chip_gen: v6e
topology: v6e:2x2x1
jax: 0.10.0
libtpu: 0.0.40
codegen_flags: <defaults>
</compile_context>

<pallas_src>
import math

import jax
import jax.numpy as jnp
from jax import lax
from jax.experimental import pallas as pl
from jax.experimental.pallas import tpu as pltpu


def _round_up(x, m):
    return ((x + m - 1) // m) * m


def _choose_tiling(rows, row_bytes, target_bytes):
    """Pick (row_tile, padded_rows): row_tile % 8 == 0, padded_rows % row_tile == 0,
    aiming for ~target_bytes moved per grid step."""
    tile = max(8, (int(target_bytes) // int(row_bytes)) // 8 * 8)
    rows8 = _round_up(max(int(rows), 1), 8)
    if rows8 <= tile:
        return rows8, rows8
    # Prefer an exact multiple-of-8 divisor reasonably close to the target
    # (no extra padding / no extra copy of x); otherwise pad up to the tile.
    t = tile
    while t >= 8 and 4 * t >= tile:
        if rows8 % t == 0:
            return t, rows8
        t -= 8
    return tile, _round_up(rows8, tile)


# ---------------------------------------------------------------------------
# Fused single-call path (whole x resident in VMEM) for small inputs.
# ---------------------------------------------------------------------------
def _fused_kernel(x_ref, wt_ref, b_ref, att_ref, z_ref):
    M, N, H = x_ref.shape
    x = x_ref[...]
    x2d = x.reshape(M * N, H)
    h = lax.dot_general(x2d, wt_ref[...],
                        dimension_numbers=(((1,), (0,)), ((), ())),
                        preferred_element_type=jnp.float32)
    h = jnp.tanh(h + b_ref[...].astype(jnp.float32))
    sp = h.reshape(M, N, H).sum(axis=1) * (1.0 / N)              # [M, H]
    att = att_ref[...].astype(jnp.float32)                       # [1, H]
    scores = jnp.sum(sp * att, axis=-1, keepdims=True)           # [M, 1]
    scores = scores - jnp.max(scores, axis=0, keepdims=True)     # stable softmax
    e = jnp.exp(scores)
    beta = e / jnp.sum(e, axis=0, keepdims=True)                 # [M, 1]
    acc = x[0].astype(jnp.float32) * beta[0:1, :]
    for m in range(1, M):
        acc = acc + x[m].astype(jnp.float32) * beta[m:m + 1, :]
    z_ref[...] = acc.astype(z_ref.dtype)


def _fused_forward(x, w, b, att):
    M, N, H = x.shape
    itemsize = jnp.dtype(x.dtype).itemsize
    wt = w.T.astype(x.dtype)
    ce = pl.CostEstimate(
        flops=2 * M * N * H * H + 2 * M * N * H,
        transcendentals=M * N * H,
        bytes_accessed=(M * N * H + N * H) * itemsize + (H * H + 2 * H) * 4,
    )
    return pl.pallas_call(
        _fused_kernel,
        out_shape=jax.ShapeDtypeStruct((N, H), x.dtype),
        cost_estimate=ce,
    )(x, wt, b, att)


# ---------------------------------------------------------------------------
# Phase A (large path): accumulate per-view node-sums of tanh(fc(x)).
# ---------------------------------------------------------------------------
def _phase_a_kernel(x_ref, wt_ref, bb_ref, sp_ref, acc_ref):
    s = pl.program_id(1)

    @pl.when(s == 0)
    def _init():
        acc_ref[...] = jnp.zeros_like(acc_ref)

    M, tp, Lw = x_ref.shape
    x2d = x_ref[...].reshape(M * tp, Lw)             # collapse leading dims (free)
    h = lax.dot_general(x2d, wt_ref[...],
                        dimension_numbers=(((1,), (0,)), ((), ())),
                        preferred_element_type=jnp.float32)
    h = jnp.tanh(h + bb_ref[...])                    # lane-dense tanh / bias
    acc_ref[...] += h.reshape(M, tp, Lw).sum(axis=1)
    sp_ref[0] = acc_ref[...]                         # cheap; final step is correct


def _phase_a_beta(x, w, b, att, a_block_bytes):
    M, N, H = x.shape
    itemsize = jnp.dtype(x.dtype).itemsize

    # Lane packing so the tanh/bias/sum lane axis is a multiple of 128.
    if H % 128 == 0:
        Hp, p = H, 1
    elif 128 % H == 0:
        Hp, p = H, 128 // H
    else:
        Hp, p = _round_up(H, 128), 1                 # fallback: pad features
    Lw = Hp * p

    wA, bA, xA = w, b, x
    if Hp != H:
        wA = jnp.pad(w, ((0, Hp - H), (0, Hp - H)))
        bA = jnp.pad(b, ((0, 0), (0, Hp - H)))
        xA = jnp.pad(x, ((0, 0), (0, 0), (0, Hp - H)))
    wt = wA.T                                        # pre-transpose once (wrapper)
    if p > 1:
        wt_big = jnp.kron(jnp.eye(p, dtype=wt.dtype), wt)   # block-diagonal [Lw, Lw]
    else:
        wt_big = wt
    wt_big = wt_big.astype(x.dtype)
    b_big = jnp.tile(bA, (1, p)).astype(jnp.float32)         # [1, Lw]

    rows = pl.cdiv(N * Hp, Lw)
    tp, rows_pad = _choose_tiling(rows, M * Lw * itemsize, a_block_bytes)
    steps = rows_pad // tp
    G = 2 if steps >= 2 else 1       # megacore slabs (v7x); harmless on 1-TC chips
    S = (steps + G - 1) // G
    rows_pad = G * S * tp

    xf = xA.reshape(M, N * Hp)
    pad = rows_pad * Lw - N * Hp
    if pad:
        # Zero "fake nodes": each adds the same tanh(b) term to every view's
        # sum, i.e. a constant shift of all scores that cancels in the softmax.
        xf = jnp.pad(xf, ((0, 0), (0, pad)))
    xp = xf.reshape(M, rows_pad, Lw)

    ce = pl.CostEstimate(
        flops=2 * M * rows_pad * Lw * Lw,
        transcendentals=M * rows_pad * Lw,
        bytes_accessed=M * rows_pad * Lw * itemsize + Lw * Lw * itemsize,
    )
    sp_slabs = pl.pallas_call(
        _phase_a_kernel,
        out_shape=jax.ShapeDtypeStruct((G, M, Lw), jnp.float32),
        grid=(G, S),
        in_specs=[
            pl.BlockSpec((M, tp, Lw), lambda g, s: (0, g * S + s, 0)),
            pl.BlockSpec((Lw, Lw), lambda g, s: (0, 0)),      # W.T blocks (resident)
            pl.BlockSpec((1, Lw), lambda g, s: (0, 0)),       # bias (resident)
        ],
        out_specs=pl.BlockSpec((1, M, Lw), lambda g, s: (g, 0, 0)),
        scratch_shapes=[pltpu.VMEM((M, Lw), jnp.float32)],
        compiler_params=pltpu.CompilerParams(
            dimension_semantics=("parallel", "arbitrary"),
            vmem_limit_bytes=32 * 1024 * 1024),
        cost_estimate=ce,
    )(xp, wt_big, b_big)

    # Tiny finalize in the wrapper: fold slabs + lane packing, mean, att·sp, softmax.
    sp_sum = jnp.sum(sp_slabs, axis=0)                        # [M, Lw]
    sp = sp_sum.reshape(M, p, Hp).sum(axis=1)[:, :H] / N      # mean over true N
    scores = jnp.sum(sp * att.astype(jnp.float32), axis=-1)   # [M]
    return jax.nn.softmax(scores)                             # [M] f32


# ---------------------------------------------------------------------------
# Phase B (large path): z = sum_m beta[m] * x[m], lane-dense tiles.
# ---------------------------------------------------------------------------
def _phase_b_kernel(beta_ref, x_ref, z_ref):
    M = x_ref.shape[0]
    acc = x_ref[0] * beta_ref[0]                 # beta: SMEM scalars, unrolled sum
    for m in range(1, M):
        acc = acc + x_ref[m] * beta_ref[m]
    z_ref[...] = acc.astype(z_ref.dtype)


def _phase_b_combine(x, beta, b_block_bytes):
    M, N, H = x.shape
    itemsize = jnp.dtype(x.dtype).itemsize
    rows = pl.cdiv(N * H, 128)
    tr, rows_pad = _choose_tiling(rows, (M + 1) * 128 * itemsize, b_block_bytes)

    xf = x.reshape(M, N * H)
    pad = rows_pad * 128 - N * H
    if pad:
        xf = jnp.pad(xf, ((0, 0), (0, pad)))      # zero pad -> zero z rows (dropped)
    xb = xf.reshape(M, rows_pad, 128)

    ce = pl.CostEstimate(
        flops=2 * M * rows_pad * 128,
        transcendentals=0,
        bytes_accessed=(M + 1) * rows_pad * 128 * itemsize,
    )
    zf = pl.pallas_call(
        _phase_b_kernel,
        out_shape=jax.ShapeDtypeStruct((rows_pad, 128), x.dtype),
        grid=(rows_pad // tr,),
        in_specs=[
            pl.BlockSpec(memory_space=pltpu.MemorySpace.SMEM),   # beta scalars
            pl.BlockSpec((M, tr, 128), lambda i: (0, i, 0)),
        ],
        out_specs=pl.BlockSpec((tr, 128), lambda i: (i, 0)),
        compiler_params=pltpu.CompilerParams(
            dimension_semantics=("parallel",),
            vmem_limit_bytes=32 * 1024 * 1024),
        cost_estimate=ce,
    )(beta, xb)
    return zf.reshape(-1)[: N * H].reshape(N, H)


# ---------------------------------------------------------------------------
# Public wrapper.
# ---------------------------------------------------------------------------
def semantic_attention(x, w, b, att, *,
                       fused_bytes_limit=4 * 1024 * 1024,
                       a_block_bytes=3 * 1024 * 1024,
                       b_block_bytes=8 * 1024 * 1024):
    """x: [M, N, H] stacked embeds; w: [H, H]; b, att: [1, H]. Returns z: [N, H]."""
    M, N, H = x.shape
    if x.size * jnp.dtype(x.dtype).itemsize <= fused_bytes_limit:
        return _fused_forward(x, w, b, att)        # single HBM read of x
    beta = _phase_a_beta(x, w, b, att, a_block_bytes)
    return _phase_b_combine(x, beta, b_block_bytes)


def reference_jax(x, w, b, att):
    """Pure-JAX reference mirroring the PyTorch forward."""
    M = x.shape[0]
    scores = []
    for m in range(M):
        sp = jnp.tanh(x[m] @ w.T + b[0]).mean(axis=0)
        scores.append(jnp.dot(att[0], sp))
    beta = jax.nn.softmax(jnp.stack(scores))
    z = sum(x[m] * beta[m] for m in range(M))
    return z


def _make_inputs(key, M, N, H):
    k_x, k_w, k_b, k_att = jax.random.split(key, 4)
    x = jax.random.normal(k_x, (M, N, H), dtype=jnp.float32)
    # deterministic parameter init matching the PyTorch module's __init__:
    gain = 1.414
    w_std = gain * math.sqrt(2.0 / (H + H))             # xavier_normal_
    w = w_std * jax.random.normal(k_w, (H, H), dtype=jnp.float32)
    b_bound = 1.0 / math.sqrt(H)                        # default Linear bias init
    b = jax.random.uniform(k_b, (1, H), dtype=jnp.float32,
                           minval=-b_bound, maxval=b_bound)
    att_std = gain * math.sqrt(2.0 / (1 + H))           # xavier_normal_
    att = att_std * jax.random.normal(k_att, (1, H), dtype=jnp.float32)
    return x, w, b, att


if __name__ == "__main__":
    # 1) Small shapes (M=3 views, N=16 nodes, H=32): fused resident path.
    M, N, H = 3, 16, 32
    x, w, b, att = _make_inputs(jax.random.PRNGKey(0), M, N, H)
    z = semantic_attention(x, w, b, att)
    jax.block_until_ready(z)
    z_ref = reference_jax(x, w, b, att)
    assert z.shape == (N, H)
    assert jnp.allclose(z, z_ref, atol=2e-5, rtol=2e-5)

    # 2) Force the tiled two-phase path with small block targets so the
    #    slab / accumulator / lane-dense grid logic is exercised at small size.
    M2, N2, H2 = 3, 2048, 32
    x2, w2, b2, att2 = _make_inputs(jax.random.PRNGKey(1), M2, N2, H2)
    z2 = semantic_attention(x2, w2, b2, att2, fused_bytes_limit=0,
                            a_block_bytes=64 * 1024, b_block_bytes=256 * 1024)
    jax.block_until_ready(z2)
    z2_ref = reference_jax(x2, w2, b2, att2)
    assert z2.shape == (N2, H2)
    assert jnp.allclose(z2, z2_ref, atol=1e-4, rtol=1e-4)

    # 3) Padding paths: N*H not a multiple of 128 and H that doesn't divide 128.
    M3, N3, H3 = 3, 300, 48
    x3, w3, b3, att3 = _make_inputs(jax.random.PRNGKey(2), M3, N3, H3)
    z3 = semantic_attention(x3, w3, b3, att3, fused_bytes_limit=0,
                            a_block_bytes=64 * 1024, b_block_bytes=256 * 1024)
    jax.block_until_ready(z3)
    z3_ref = reference_jax(x3, w3, b3, att3)
    assert z3.shape == (N3, H3)
    assert jnp.allclose(z3, z3_ref, atol=1e-4, rtol=1e-4)

    print("KERNEL_OK")
</pallas_src>

<mosaic_0001>
module attributes {stable_mosaic.version = 11 : i64} {
  func.func @_fused_kernel(%arg0: memref<3x16x32xf32, #tpu.memory_space<vmem>>, %arg1: memref<32x32xf32, #tpu.memory_space<vmem>>, %arg2: memref<1x32xf32, #tpu.memory_space<vmem>>, %arg3: memref<1x32xf32, #tpu.memory_space<vmem>>, %arg4: memref<16x32xf32, #tpu.memory_space<vmem>>) attributes {dimension_semantics = [], scalar_prefetch = 0 : i64, scratch_operands = 0 : i64, tpu.core_type = #tpu.core_type<tc>} {
    %c0 = arith.constant 0 : index
    %c0_0 = arith.constant 0 : index
    %c0_1 = arith.constant 0 : index
    %0 = vector.load %arg0[%c0, %c0_0, %c0_1] : memref<3x16x32xf32, #tpu.memory_space<vmem>>, vector<3x16x32xf32>
    %1 = vector.shape_cast %0 : vector<3x16x32xf32> to vector<48x32xf32>
    %c0_2 = arith.constant 0 : index
    %c0_3 = arith.constant 0 : index
    %2 = vector.load %arg1[%c0_2, %c0_3] : memref<32x32xf32, #tpu.memory_space<vmem>>, vector<32x32xf32>
    %cst = arith.constant dense<0.000000e+00> : vector<48x32xf32>
    %3 = tpu.matmul %1, %2, %cst {dimension_numbers = #tpu.dot_dimension_numbers<[1], [0], [0], [1], [0, 0, 1, 1], [], []>} : vector<48x32xf32>, vector<32x32xf32>, vector<48x32xf32> -> vector<48x32xf32>
    %c0_4 = arith.constant 0 : index
    %c0_5 = arith.constant 0 : index
    %4 = vector.load %arg2[%c0_4, %c0_5] : memref<1x32xf32, #tpu.memory_space<vmem>>, vector<1x32xf32>
    %5 = vector.broadcast %4 : vector<1x32xf32> to vector<48x32xf32>
    %6 = arith.addf %3, %5 : vector<48x32xf32>
    %7 = math.tanh %6 : vector<48x32xf32>
    %8 = vector.shape_cast %7 : vector<48x32xf32> to vector<3x16x32xf32>
    %cst_6 = arith.constant dense<0.000000e+00> : vector<3x32xf32>
    %9 = vector.multi_reduction <add>, %8, %cst_6 [1] : vector<3x16x32xf32> to vector<3x32xf32>
    %cst_7 = arith.constant 6.250000e-02 : f32
    %10 = vector.broadcast %cst_7 : f32 to vector<3x32xf32>
    %11 = arith.mulf %9, %10 : vector<3x32xf32>
    %c0_8 = arith.constant 0 : index
    %c0_9 = arith.constant 0 : index
    %12 = vector.load %arg3[%c0_8, %c0_9] : memref<1x32xf32, #tpu.memory_space<vmem>>, vector<1x32xf32>
    %13 = vector.broadcast %12 : vector<1x32xf32> to vector<3x32xf32>
    %14 = arith.mulf %11, %13 : vector<3x32xf32>
    %cst_10 = arith.constant dense<0.000000e+00> : vector<3xf32>
    %15 = vector.multi_reduction <add>, %14, %cst_10 [1] : vector<3x32xf32> to vector<3xf32>
    %16 = vector.shape_cast %15 : vector<3xf32> to vector<3x1xf32>
    %cst_11 = arith.constant dense<0xFF800000> : vector<1xf32>
    %17 = vector.multi_reduction <maximumf>, %16, %cst_11 [0] : vector<3x1xf32> to vector<1xf32>
    %18 = vector.shape_cast %17 : vector<1xf32> to vector<1x1xf32>
    %19 = vector.broadcast %18 : vector<1x1xf32> to vector<3x1xf32>
    %20 = arith.subf %16, %19 : vector<3x1xf32>
    %21 = math.exp %20 : vector<3x1xf32>
    %cst_12 = arith.constant dense<0.000000e+00> : vector<1xf32>
    %22 = vector.multi_reduction <add>, %21, %cst_12 [0] : vector<3x1xf32> to vector<1xf32>
    %23 = vector.shape_cast %22 : vector<1xf32> to vector<1x1xf32>
    %24 = vector.broadcast %23 : vector<1x1xf32> to vector<3x1xf32>
    %25 = arith.divf %21, %24 : vector<3x1xf32>
    %26 = vector.extract_strided_slice %0 {offsets = [0, 0, 0], sizes = [1, 16, 32], strides = [1, 1, 1]} : vector<3x16x32xf32> to vector<1x16x32xf32>
    %27 = vector.shape_cast %26 : vector<1x16x32xf32> to vector<16x32xf32>
    %28 = vector.extract_strided_slice %25 {offsets = [0, 0], sizes = [1, 1], strides = [1, 1]} : vector<3x1xf32> to vector<1x1xf32>
    %29 = vector.broadcast %28 : vector<1x1xf32> to vector<16x32xf32>
    %30 = arith.mulf %27, %29 : vector<16x32xf32>
    %31 = vector.extract_strided_slice %0 {offsets = [1, 0, 0], sizes = [1, 16, 32], strides = [1, 1, 1]} : vector<3x16x32xf32> to vector<1x16x32xf32>
    %32 = vector.shape_cast %31 : vector<1x16x32xf32> to vector<16x32xf32>
    %33 = vector.extract_strided_slice %25 {offsets = [1, 0], sizes = [1, 1], strides = [1, 1]} : vector<3x1xf32> to vector<1x1xf32>
    %34 = vector.broadcast %33 : vector<1x1xf32> to vector<16x32xf32>
    %35 = arith.mulf %32, %34 : vector<16x32xf32>
    %36 = arith.addf %30, %35 : vector<16x32xf32>
    %37 = vector.extract_strided_slice %0 {offsets = [2, 0, 0], sizes = [1, 16, 32], strides = [1, 1, 1]} : vector<3x16x32xf32> to vector<1x16x32xf32>
    %38 = vector.shape_cast %37 : vector<1x16x32xf32> to vector<16x32xf32>
    %39 = vector.extract_strided_slice %25 {offsets = [2, 0], sizes = [1, 1], strides = [1, 1]} : vector<3x1xf32> to vector<1x1xf32>
    %40 = vector.broadcast %39 : vector<1x1xf32> to vector<16x32xf32>
    %41 = arith.mulf %38, %40 : vector<16x32xf32>
    %42 = arith.addf %36, %41 : vector<16x32xf32>
    %c0_13 = arith.constant 0 : index
    %c0_14 = arith.constant 0 : index
    %43 = vector.load %arg4[%c0_13, %c0_14] : memref<16x32xf32, #tpu.memory_space<vmem>>, vector<16x32xf32>
    tpu.vector_store %arg4[%c0_13, %c0_14], %42 {strides = array<i32>} : memref<16x32xf32, #tpu.memory_space<vmem>>, vector<16x32xf32>,
    return
  }
}

</mosaic_0001>

<bundles_post_ra>
// kernel: tpu_custom_call.1
= control target key start
LH: loop header
LB: loop body
LE: loop exit
PB: predicated region body
PF: predicated region fallthrough
CT: control target
= control target key end

     0   :  { %9 = vsyncpa [#allocation3], 0  ;;  %s521_s0 = inlined_call_operand.hbm [shape: f32[3,16,32], index: 0, kind: input, shape index: {}]   ;;  %s522_s1 = inlined_call_operand.hbm [shape: f32[32,32], index: 1, kind: input, shape index: {}]   ;;  %s523_s2 = inlined_call_operand.vmem [shape: f32[1,32], index: 2, kind: input, shape index: {}]   ;;  %s524_s3 = inlined_call_operand.vmem [shape: f32[1,32], index: 3, kind: input, shape index: {}]   ;;  %s525_s4 = inlined_call_operand.hbm [shape: f32[16,32], index: 4, kind: output, shape index: {}]  }
   0x1   :  { %10 = vsyncpa [#allocation6], 0 }
   0x2   :  { %11 = vsyncpa [#allocation4], 0  ;;  %s429_s15 = smov [#allocation2]  }
   0x3   :  { %s17_s16 = sshll.u32 %s429_s15, 4  ;;  %s18_s16 = int_to_ptr.vmem [resolvable:$true] %s17_s16 }
   0x4   :  { %s371_s17 = scalar_lea.vmem %s18_s16, 768  ;;  %p376_p1 = scmp.lt.s32.totalorder %s18_s16, %s18_s16 }
   0x5   :  { %p372_p0 = scmp.ne.s32.totalorder %s18_s16, %s371_s17  ;;  %p377_p2 = scmp.lt.s32.totalorder %s371_s17, %s371_s17 }
   0x7   :  { %p378_p3 = por %p377_p2, %p376_p1 }
   0x9   :  { %p379_p4 = pnand %p378_p3, %p372_p0 }
   0xb   :  { %382 = shalt.err (!%p379_p4)
}
   0xc   :  { %s430_s18 = smov 128   ;;  %s431_s19 = smov 8  }
   0xd   :  { %23 = dma.hbm_to_vmem [thread:$0]  %s521_s0, 768, %s18_s16, [#allocation3], %s430_s18, %s430_s18, %s431_s19  }
   0xe   :  { %s432_s22 = smov [#allocation5]  }
   0xf   :  { %s29_s23 = sshll.u32 %s432_s22, 4  ;;  %s30_s23 = int_to_ptr.vmem [resolvable:$true] %s29_s23 }
  0x10   :  { %s391_s24 = scalar_lea.vmem %s30_s23, 512  ;;  %p396_p6 = scmp.lt.s32.totalorder %s30_s23, %s30_s23 }
  0x11   :  { %p392_p5 = scmp.ne.s32.totalorder %s30_s23, %s391_s24  ;;  %p397_p7 = scmp.lt.s32.totalorder %s391_s24, %s391_s24 }
  0x13   :  { %p398_p8 = por %p397_p7, %p396_p6 }
  0x15   :  { %p399_p9 = pnand %p398_p8, %p392_p5 }
  0x17   :  { %402 = shalt.err (!%p399_p9)
}
  0x18   :  { %35 = dma.hbm_to_vmem [thread:$0]  %s522_s1, 512, %s30_s23, [#allocation6], %s430_s18, %s430_s18, %s431_s19  }
  0x19   :  { %423 = dma.done.wait [#allocation3], 768  }
  0x1a   :  { %424 = vsyncadd [#allocation3], 4294966528 }
  0x1b   :  { %425 = dma.done.wait [#allocation6], 512  }
  0x1c   :  { %426 = vsyncadd [#allocation6], 4294966784  ;;  %v55_v0 = vld [vmem:[#allocation5 + $0x18] sm:$0xff]  ;;  %v54_v1 = vld [vmem:[#allocation5 + $0x10] sm:$0xff]  ;;  %vm63_vm0 = vcmask 261120   ;;  %vm227_vm1 = vcmask 1041409  }
  0x1d   :  { %317 = vmatprep.subr.mxu0 %v55_v0  ;;  %334 = vmatprep.subr.mxu1 %v55_v0  ;;  %v53_v2 = vld [vmem:[#allocation5 + $0x8] sm:$0xff]  ;;  %v52_v3 = vld [vmem:[#allocation5] sm:$0xff]  ;;  %v471_v4 = vld [vmem:[#allocation2] sm:$0xff]  ;;  %vm230_vm2 = vcmask 1042434   ;;  %vm233_vm3 = vcmask 256000   ;;  %vm237_vm4 = vcmask 1042432  }
  0x1e   :  { %318 = vmatpush3.msra.mxu0 %v55_v0  ;;  %338 = vmatpush3.msra.mxu1 %v55_v0  ;;  %v473_v5 = vld [vmem:[#allocation2 + $0x10] sm:$0xff]  ;;  %v475_v6 = vld [vmem:[#allocation2 + $0x8] sm:$0xff]  ;;  %v477_v7 = vld [vmem:[#allocation2 + $0x18] sm:$0xff] }
  0x1f   :  { %319 = vmatprep.subr.mxu0 %v54_v1  ;;  %335 = vmatprep.subr.mxu1 %v54_v1  ;;  %v479_v8 = vld [vmem:[#allocation2 + $0x20] sm:$0xff]  ;;  %v491_v9 = vld [vmem:[#allocation2 + $0x28] sm:$0xff] }
  0x20   :  { %320 = vmatpush3.msra.mxu0 %v54_v1  ;;  %339 = vmatpush3.msra.mxu1 %v54_v1  ;;  %v299_v10 = vld [vmem:[%s523_s2] ss:$0 sm:$0xff] }
  0x21   :  { %321 = vmatprep.subr.mxu0 %v53_v2  ;;  %336 = vmatprep.subr.mxu1 %v53_v2  ;;  %v306_v55 = vld [vmem:[%s524_s3] ss:$0 sm:$0xff]  ;;  %s433_s3 = smov [#allocation7]  }
  0x22   :  { %322 = vmatpush3.msra.mxu0 %v53_v2  ;;  %340 = vmatpush3.msra.mxu1 %v53_v2  ;;  %s286_s28 = sshll.u32 %s433_s3, 4  ;;  %s287_s28 = int_to_ptr.vmem [resolvable:$true] %s286_s28 }
  0x23   :  { %323 = vmatprep.subr.mxu0 %v52_v3  ;;  %337 = vmatprep.subr.mxu1 %v52_v3  ;;  %s403_s29 = scalar_lea.vmem %s287_s28, 256  ;;  %p408_p11 = scmp.lt.s32.totalorder %s287_s28, %s287_s28 }
  0x24   :  { %324 = vmatpush3.msra.mxu0 %v52_v3  ;;  %341 = vmatpush3.msra.mxu1 %v52_v3  ;;  %p404_p10 = scmp.ne.s32.totalorder %s287_s28, %s403_s29  ;;  %p409_p12 = scmp.lt.s32.totalorder %s403_s29, %s403_s29 }
  0x25   :  { %325 = vmatprep.mubr.msk.f32.mxu0 %vm63_vm0, %v471_v4  ;;  %328 = vmatprep.mubr.msk.f32.mxu1 %vm63_vm0, %v473_v5 }
  0x26   :  { %326 = vmatmul.mubr.msk.f32.vlgmr.msra.gmra.mxu0 %vm63_vm0, %v475_v6  ;;  %329 = vmatmul.mubr.msk.f32.vlgmr.msra.gmra.mxu1 %vm63_vm0, %v477_v7  ;;  %p410_p13 = por %p409_p12, %p408_p11 }
  0x27   :  { %331 = vmatprep.mubr.msk.f32.mxu1 %vm63_vm0, %v479_v8 }
  0x28   :  { %p411_p0 = pnand %p410_p13, %p404_p10 }
  0x2a   :  { %332 = vmatmul.mubr.msk.f32.gmra.mxu1 %vm63_vm0, %v491_v9 }
  0xe6   :  { %v327_v11 = vpop.f32.mrf.mxu0  ;;  %v330_v12 = vpop.f32.mrf.mxu1 }
  0xe7   :  { %v154_v13 = vadd.f32 %v327_v11, %v299_v10  ;;  %v164_v14 = vadd.f32 %v330_v12, %v299_v10 }
  0xe8   :  { %v148_v15 = vpop.f32.mrf.mxu0  ;;  %v158_v16 = vpop.f32.mrf.mxu1 }
  0xe9   :  { %347 = vtanh.f32 %v154_v13  ;;  %v149_v17 = vadd.f32 %v299_v10, %v148_v15  ;;  %v159_v18 = vadd.f32 %v299_v10, %v158_v16 }
  0xea   :  { %349 = vtanh.f32 %v164_v14  ;;  %v333_v19 = vpop.f32.mrf.mxu1 }
  0xeb   :  { %351 = vtanh.f32 %v149_v17  ;;  %v174_v20 = vadd.f32 %v333_v19, %v299_v10 }
  0xec   :  { %353 = vtanh.f32 %v159_v18  ;;  %v168_v21 = vpop.f32.mrf.mxu1 }
  0xed   :  { %355 = vtanh.f32 %v174_v20  ;;  %v169_v22 = vadd.f32 %v299_v10, %v168_v21 }
  0xef   :  { %357 = vtanh.f32 %v169_v22 }
  0xf6   :  { %v348_v23 = vpop.eup %347 }
  0xf7   :  { %v350_v24 = vpop.eup %349  ;;  %v184_v25 = vsel %vm63_vm0, %v348_v23, 0.0 }
  0xf8   :  { %v352_v26 = vpop.eup %351  ;;  %v193_v30 = vsel %vm63_vm0, %v350_v24, 0.0 }
  0xf9   :  { %v354_v27 = vpop.eup %353  ;;  %v183_v28 = vsel %vm63_vm0, %v352_v26, 0.0 }
  0xfa   :  { %v356_v29 = vpop.eup %355  ;;  %v192_v31 = vsel %vm63_vm0, %v354_v27, 0.0  ;;  %v185_v32 = vadd.f32 %v184_v25, %v183_v28  ;;  %v257_v28 = vlaneseq }
  0xfb   :  { %v194_v33 = vadd.f32 %v193_v30, %v192_v31  ;;  %v202_v36 = vsel %vm63_vm0, %v356_v29, 0.0 }
  0xfc   :  { %v358_v34 = vpop.eup %357  ;;  %v186_v35 = vrot.slane %v185_v32, 4  ;;  %v258_v29 = vshrl.u32 %v257_v28, 7 }
  0xfd   :  { %v201_v37 = vsel %vm63_vm0, %v358_v34, 0.0  ;;  %v195_v38 = vrot.slane %v194_v33, 4 }
  0xfe   :  { %v187_v39 = vadd.f32 %v186_v35, %v185_v32  ;;  %v203_v40 = vadd.f32 %v202_v36, %v201_v37  ;;  %v259_v30 = vsub.s32 0, %v258_v29  ;;  %v265_v31 = vsub.s32 1, %v258_v29 }
  0xff   :  { %v196_v41 = vadd.f32 %v195_v38, %v194_v33  ;;  %v273_v32 = vsub.s32 2, %v258_v29 }
 0x100   :  { %v188_v42 = vrot.slane %v187_v39, 2  ;;  %v204_v43 = vrot.slane %v203_v40, 4 }
 0x101   :  { %v197_v44 = vrot.slane %v196_v41, 2 }
 0x102   :  { %v189_v45 = vadd.f32 %v188_v42, %v187_v39  ;;  %v205_v46 = vadd.f32 %v204_v43, %v203_v40 }
 0x103   :  { %v198_v47 = vadd.f32 %v197_v44, %v196_v41 }
 0x104   :  { %v190_v48 = vrot.slane %v189_v45, 1  ;;  %v206_v49 = vrot.slane %v205_v46, 2 }
 0x105   :  { %v199_v50 = vrot.slane %v198_v47, 1 }
 0x106   :  { %v207_v51 = vadd.f32 %v206_v49, %v205_v46  ;;  %v191_v52 = vadd.f32 %v190_v48, %v189_v45 }
 0x107   :  { %v200_v53 = vadd.f32 %v199_v50, %v198_v47 }
 0x108   :  { %v208_v54 = vrot.slane %v207_v51, 1  ;;  %v210_v58 = vmul.f32 0.0625, %v191_v52 }
 0x109   :  { %v211_v56 = vmul.f32 0.0625, %v200_v53 }
 0x10a   :  { %v209_v57 = vadd.f32 %v208_v54, %v207_v51  ;;  %v220_v63 = vmul.f32 %v306_v55, %v210_v58 }
 0x10b   :  { %v221_v59 = vmul.f32 %v306_v55, %v211_v56 }
 0x10c   :  { %v212_v60 = vmul.f32 0.0625, %v209_v57 }
 0x10d   :  { %v226_v61 = vrot.slane %v221_v59, 7 }
 0x10e   :  { %v222_v62 = vmul.f32 %v306_v55, %v212_v60 }
 0x10f   :  { %v228_v1 = vsel %vm227_vm1, %v226_v61, %v220_v63 }
 0x110   :  { %v229_v0 = vrot.slane %v222_v62, 6 }
 0x112   :  { %v231_v2 = vsel %vm230_vm2, %v229_v0, %v228_v1 }
 0x113   :  { %v234_v3 = vsel %vm233_vm3, %v231_v2, 0.0 }
 0x114   :  { %235 = vadd.xlane.f32.xlu0 %v234_v3 }
 0x19d   :  { %v236_v10 = vpop.xlane.xlu0 %235 }
 0x19e   :  { %v238_v11 = vsel %vm237_vm4, %v236_v10, -inf }
 0x19f   :  { %v239_v12 = vrot.slane %v238_v11, 4 }
 0x1a1   :  { %v240_v13 = vmax.f32 %v238_v11, %v239_v12 }
 0x1a3   :  { %v241_v14 = vrot.slane %v240_v13, 2 }
 0x1a5   :  { %v242_v15 = vmax.f32 %v240_v13, %v241_v14 }
 0x1a7   :  { %v243_v16 = vrot.slane %v242_v15, 1 }
 0x1a9   :  { %v244_v17 = vmax.f32 %v242_v15, %v243_v16 }
 0x1ab   :  { %v245_v18 = vsub.f32 %v236_v10, %v244_v17 }
 0x1ad   :  { %v246_v19 = vmul.f32 1.442695, %v245_v18 }
 0x1af   :  { %359 = vpow2.f32 %v246_v19 }
 0x1bc   :  { %v360_v20 = vpop.eup %359 }
 0x1bd   :  { %v248_v21 = vsel %vm237_vm4, %v360_v20, 0.0 }
 0x1be   :  { %v249_v22 = vrot.slane %v248_v21, 4 }
 0x1c0   :  { %v250_v23 = vadd.f32 %v249_v22, %v248_v21 }
 0x1c2   :  { %v251_v24 = vrot.slane %v250_v23, 2 }
 0x1c4   :  { %v252_v25 = vadd.f32 %v251_v24, %v250_v23 }
 0x1c6   :  { %v253_v26 = vrot.slane %v252_v25, 1 }
 0x1c8   :  { %v254_v27 = vadd.f32 %v253_v26, %v252_v25 }
 0x1ca   :  { %361 = vrcp.f32 %v254_v27 }
 0x1d7   :  { %v362_v33 = vpop.eup %361 }
 0x1d8   :  { %v256_v34 = vmul.f32 %v362_v33, %v360_v20 }
 0x1da   :  { %v260_v35 = vrot.slane %v256_v34, %v259_v30  ;;  %v266_v36 = vrot.slane %v256_v34, %v265_v31  ;;  %v274_v37 = vrot.slane %v256_v34, %v273_v32 }
 0x1dc   :  { %v261_v38 = vmul.f32 %v260_v35, %v471_v4  ;;  %v262_v39 = vmul.f32 %v260_v35, %v475_v6  ;;  %v267_v40 = vmul.f32 %v266_v36, %v473_v5  ;;  %v268_v41 = vmul.f32 %v266_v36, %v477_v7 }
 0x1dd   :  { %v275_v44 = vmul.f32 %v274_v37, %v479_v8  ;;  %v276_v45 = vmul.f32 %v274_v37, %v491_v9 }
 0x1de   :  { %v269_v42 = vadd.f32 %v267_v40, %v261_v38  ;;  %v270_v43 = vadd.f32 %v268_v41, %v262_v39 }
 0x1e0   :  { %v277_v46 = vadd.f32 %v275_v44, %v269_v42  ;;  %v278_v47 = vadd.f32 %v276_v45, %v270_v43 }
 0x1e2   :  { %279 = vst.msk [vmem:[#allocation7] sm:$0xff] %vm63_vm0, %v277_v46  ;;  %280 = vst.msk [vmem:[#allocation7 + $0x8] sm:$0xff] %vm63_vm0, %v278_v47 }
 0x1e3   :  { %414 = shalt.err (!%p411_p0)
}
 0x1e4   :  { %292 = dma.vmem_to_hbm [thread:$0]  %s287_s28, 256, %s525_s4, [#allocation4], %s430_s18, %s430_s18, %s431_s19  }
 0x1e5   :  { %427 = dma.done.wait [#allocation4], 256  }
 0x1e6   :  { %428 = vsyncadd [#allocation4], 4294967040 }
 0x1e7   :  { %296 = vsyncpa [#allocation3], 1 }
 0x1e8   :  { %297 = vsyncpa [#allocation6], 1 }
 0x1e9   :  { %298 = vsyncpa [#allocation4], 1 }

</bundles_post_ra>
